<compile_context>
chip_gen: v5e
topology: v5e:2x2
jax: 0.10.0
libtpu: 0.0.40
codegen_flags: <defaults>
</compile_context>

<pallas_src>
import functools

import jax
import jax.numpy as jnp
from jax.experimental import pallas as pl
from jax.experimental.pallas import tpu as pltpu


def _round_up(x, m):
    return (x + m - 1) // m * m


def _involution_kernel_flat(x_ref, wf_ref, bf_ref, o_ref, *,
                            K, D, G, CG, W_in, N_out, TB, mm_dtype):
    """stride == 1 path: fully lane-dense, flattened (C, H_in*W_in) layout.

    Flat output position p = h*W_in + w (0 <= p < N_out = H*W_in - M); positions
    with (p mod W_in) >= W are junk columns, cropped away by the wrapper.
    Tap (ky,kx) reads x_flat[:, p + ky*D*W_in + kx*D] — a contiguous lane slice.
    """
    K2 = K * K
    M2 = D * ((K - 1) // 2)
    ctr = M2 * (W_in + 1)        # flat offset of the crop's (0,0) position

    # TODO(synk): for very large TB/G/K2 convert these static loops to
    # lax.fori_loop(..., unroll=True) to bound vreg live ranges (fine for K<=3).
    for tb in range(TB):
        # ---- kernel generation: one fused 1x1-conv matmul on the MXU
        # (bf16 inputs by default, f32 accumulation, f32 bias add). ----
        xp = x_ref[tb, :, pl.ds(ctr, N_out)].astype(mm_dtype)             # (C, N_out)
        ker = jnp.dot(wf_ref[...], xp,
                      preferred_element_type=jnp.float32) + bf_ref[...]   # (GK2p, N_out) f32

        # ---- involution aggregation: per-group accumulator (fits in vregs),
        # K2 taps as contiguous lane-dense slices of the flat input. ----
        for g in range(G):
            c0 = g * CG
            acc = jnp.zeros((CG, N_out), jnp.float32)
            for k in range(K2):
                ky, kx = divmod(k, K)
                s = ky * D * W_in + kx * D
                patch = x_ref[tb, pl.ds(c0, CG), pl.ds(s, N_out)].astype(jnp.float32)
                # TODO(synk): on v6e/v7x this multiply could run in bf16 (f32 acc)
                # for ~2x VALU throughput; kept f32 so v5e (no bf16 VPU) stays fast.
                acc = acc + patch * ker[g * K2 + k:g * K2 + k + 1, :]
            # lane-dense, unmasked store of this group's slab
            o_ref[tb, pl.ds(c0, CG), :] = acc.astype(o_ref.dtype)


def _involution_kernel_strided(x_ref, xp_ref, wf_ref, bf_ref, o_ref, *,
                               K, S, D, G, CG, H, W, TB, mm_dtype):
    """stride > 1 fallback: AvgPool hoisted to the wrapper, spatial (H, W) layout."""
    K2 = K * K
    for tb in range(TB):
        xp = xp_ref[tb].astype(mm_dtype)                                   # (C, H*W)
        ker = jnp.dot(wf_ref[...], xp,
                      preferred_element_type=jnp.float32) + bf_ref[...]    # (GK2p, H*W)
        ker = ker[:G * K2].reshape(G * K2, H, W)
        for g in range(G):
            c0 = g * CG
            acc = jnp.zeros((CG, H, W), jnp.float32)
            for k in range(K2):
                ky, kx = divmod(k, K)
                # TODO(synk): lane-strided ref reads; Mosaic lowering unverified for
                # exotic stride/dilation combinations (path not exercised by the test).
                patch = x_ref[tb, pl.ds(c0, CG),
                              pl.ds(ky * D, H, S), pl.ds(kx * D, W, S)].astype(jnp.float32)
                acc = acc + patch * ker[g * K2 + k:g * K2 + k + 1]
            o_ref[tb, pl.ds(c0, CG)] = acc.astype(o_ref.dtype)


def _default_vmem_limit():
    # Re-budget per generation: ~3/4 of physical VMEM (96 MiB on 128-MiB v5e/v6e,
    # 48 MiB on 64-MiB v7x); conservative 64 MiB if the query is unavailable.
    try:
        phys = pltpu.get_tpu_info().vmem_capacity_bytes
        return int(min(96 * 2**20, max(32 * 2**20, (phys * 3) // 4)))
    except Exception:
        return 64 * 2**20


def involution_forward(x, w1, b1, w2, b2, *, kernel_size, stride=1, padding=0,
                       dilation=1, groups=1, batch_tile=1,
                       matmul_dtype=jnp.bfloat16, vmem_limit_bytes=None,
                       input_buffer_count=2):
    """x: (B, C, H_in, W_in) NCHW. w1:(Cr,C) b1:(Cr,) w2:(G*K2,Cr) b2:(G*K2,).

    Returns (B, C, H, W).  `batch_tile` = batch elements per grid step (raises the
    matmul N; keep it small on v7x's 64-MiB parts).  `matmul_dtype=bf16` (default)
    runs the kernel-generation matmul at full MXU rate; pass jnp.float32 for
    bit-accurate kernels.
    """
    if padding != 0:
        # TODO(synk): the reference module's shape math is only self-consistent for padding=0.
        raise NotImplementedError("padding != 0 not supported")
    B, C, H_in, W_in = x.shape
    K, S, D, G = kernel_size, stride, dilation, groups
    if K % 2 != 1:
        raise RuntimeError(f"kernel_size ({K}) must be odd")
    if C % G != 0:
        raise RuntimeError(f"cannot group {C} channels into {G} groups")
    M = D * (K - 1)
    M2 = D * ((K - 1) // 2)
    H, W = H_in - M, W_in - M
    if H % S != 0 or W % S != 0:
        raise RuntimeError(f"input (size={H}x{W}) not divisible by stride ({S})")
    H //= S
    W //= S
    K2 = K * K
    CG = C // G
    if B % batch_tile != 0:
        batch_tile = 1
    TB = batch_tile
    if vmem_limit_bytes is None:
        vmem_limit_bytes = _default_vmem_limit()

    # Algebraically fuse the two 1x1 convs (no nonlinearity between them):
    #   ker = w2 @ (w1 @ xp + b1) + b2 = (w2 @ w1) @ xp + (w2 @ b1 + b2)
    # and pad the matmul M dim (G*K2) up to the sublane granule with zero rows.
    w_fused = jnp.dot(w2.astype(jnp.float32), w1.astype(jnp.float32),
                      preferred_element_type=jnp.float32)                   # (G*K2, C)
    b_fused = jnp.dot(w2.astype(jnp.float32), b1.astype(jnp.float32),
                      preferred_element_type=jnp.float32) + b2              # (G*K2,)
    row_align = 16 if jnp.dtype(matmul_dtype) == jnp.dtype(jnp.bfloat16) else 8
    GK2p = _round_up(G * K2, row_align)
    pad_rows = GK2p - G * K2
    if pad_rows:
        w_fused = jnp.pad(w_fused, ((0, pad_rows), (0, 0)))
        b_fused = jnp.pad(b_fused, ((0, pad_rows),))
    w_fused = w_fused.astype(matmul_dtype)
    b_fused = b_fused.astype(jnp.float32).reshape(GK2p, 1)

    compiler_params = pltpu.CompilerParams(
        dimension_semantics=("parallel",),
        vmem_limit_bytes=vmem_limit_bytes)
    # TODO(synk): on v7x (2 TensorCores) add an H-tiled (halo'd) second parallel
    # grid axis when B // TB < 2 so both cores are busy.

    x_spec_kwargs = {}
    if input_buffer_count != 2:
        # Optional deeper input pipelining when a profile shows exposed DMA.
        x_spec_kwargs["pipeline_mode"] = pl.Buffered(input_buffer_count)

    if S == 1:
        N_in = H_in * W_in
        N_out = H * W_in - M          # padded-row flat output, cropped in the wrapper
        x_flat = x.reshape(B, C, N_in)  # free (contiguous) reshape in XLA

        kern = functools.partial(
            _involution_kernel_flat,
            K=K, D=D, G=G, CG=CG, W_in=W_in, N_out=N_out, TB=TB,
            mm_dtype=matmul_dtype)

        out_flat = pl.pallas_call(
            kern,
            out_shape=jax.ShapeDtypeStruct((B, C, N_out), x.dtype),
            grid_spec=pltpu.PrefetchScalarGridSpec(
                num_scalar_prefetch=0,
                grid=(B // TB,),
                in_specs=[
                    pl.BlockSpec((TB, C, N_in), lambda b: (b, 0, 0), **x_spec_kwargs),
                    pl.BlockSpec((GK2p, C), lambda b: (0, 0)),
                    pl.BlockSpec((GK2p, 1), lambda b: (0, 0)),
                ],
                out_specs=pl.BlockSpec((TB, C, N_out), lambda b: (b, 0, 0)),
            ),
            compiler_params=compiler_params,
        )(x_flat, w_fused, b_fused)

        # Crop the padded flat layout back to (B, C, H, W) — one fused XLA copy.
        if M > 0:
            out = jnp.pad(out_flat, ((0, 0), (0, 0), (0, M)))
            out = out.reshape(B, C, H, W_in)[:, :, :, :W]
        else:
            out = out_flat.reshape(B, C, H, W)
        return out

    # ---- stride > 1 fallback ------------------------------------------------
    # Hoist the AvgPool2d(S,S) to the wrapper (removes S^2 strided reads + adds
    # from the per-step critical path); kernel keeps a spatial-layout aggregation.
    HW = H * W
    crop = x[:, :, M2:M2 + H * S, M2:M2 + W * S]
    xp = crop.astype(jnp.float32).reshape(B, C, H, S, W, S).mean(axis=(3, 5))
    xp_flat = xp.reshape(B, C, HW).astype(x.dtype)

    kern = functools.partial(
        _involution_kernel_strided,
        K=K, S=S, D=D, G=G, CG=CG, H=H, W=W, TB=TB, mm_dtype=matmul_dtype)

    out = pl.pallas_call(
        kern,
        out_shape=jax.ShapeDtypeStruct((B, C, H, W), x.dtype),
        grid_spec=pltpu.PrefetchScalarGridSpec(
            num_scalar_prefetch=0,
            grid=(B // TB,),
            in_specs=[
                pl.BlockSpec((TB, C, H_in, W_in), lambda b: (b, 0, 0, 0), **x_spec_kwargs),
                pl.BlockSpec((TB, C, HW), lambda b: (b, 0, 0)),
                pl.BlockSpec((GK2p, C), lambda b: (0, 0)),
                pl.BlockSpec((GK2p, 1), lambda b: (0, 0)),
            ],
            out_specs=pl.BlockSpec((TB, C, H, W), lambda b: (b, 0, 0, 0)),
        ),
        compiler_params=compiler_params,
    )(x, xp_flat, w_fused, b_fused)
    return out


def involution_reference(x, w1, b1, w2, b2, *, kernel_size, stride=1,
                         dilation=1, groups=1):
    """Pure-JAX reference mirroring the PyTorch forward (for verification)."""
    B, C, H_in, W_in = x.shape
    K, S, D, G = kernel_size, stride, dilation, groups
    M = D * (K - 1)
    M2 = D * ((K - 1) // 2)
    H, W = (H_in - M) // S, (W_in - M) // S
    CG, K2 = C // G, K * K

    patches = []
    for ky in range(K):
        for kx in range(K):
            patches.append(x[:, :,
                             ky * D: ky * D + (H - 1) * S + 1: S,
                             kx * D: kx * D + (W - 1) * S + 1: S])
    x_unf = jnp.stack(patches, axis=2).reshape(B, G, CG, K2, H, W)

    crop = x[:, :, M2:M2 + H * S, M2:M2 + W * S]
    xp = crop.reshape(B, C, H, S, W, S).mean(axis=(3, 5)) if S > 1 else crop
    t = jnp.einsum('oc,bchw->bohw', w1, xp) + b1[None, :, None, None]
    ker = jnp.einsum('oc,bchw->bohw', w2, t) + b2[None, :, None, None]
    ker = ker.reshape(B, G, K2, H, W)[:, :, None]
    return (ker * x_unf).sum(axis=3).reshape(B, C, H, W)


if __name__ == "__main__":
    # Module config: Involution(in_channels=8, out_channels=8, kernel_size=3,
    #                           stride=1, padding=0, dilation=1, groups=2, r=2)
    B, C, H_in, W_in = 2, 8, 18, 18
    K, S, D, G, r = 3, 1, 1, 2, 2
    Cr, K2 = C // r, K * K

    key = jax.random.PRNGKey(0)
    kx_, k1, kb1, k2, kb2 = jax.random.split(key, 5)
    x = jax.random.normal(kx_, (B, C, H_in, W_in), jnp.float32)

    # Deterministic parameter init (shapes match nn.Conv2d weights with 1x1 kernels).
    w1 = 0.1 * jax.random.normal(k1, (Cr, C), jnp.float32)          # reduce.weight (Cr,C,1,1)
    b1 = 0.1 * jax.random.normal(kb1, (Cr,), jnp.float32)           # reduce.bias
    b2 = 0.1 * jax.random.normal(kb2, (G * K2,), jnp.float32)       # get_kernels.bias
    w2 = 0.1 * jax.random.normal(k2, (G * K2, Cr), jnp.float32)     # get_kernels.weight

    ref = involution_reference(x, w1, b1, w2, b2,
                               kernel_size=K, stride=S, dilation=D, groups=G)

    H_out, W_out = H_in - D * (K - 1), W_in - D * (K - 1)

    # f32-matmul path (bit-accurate kernel generation) over both batch tilings:
    # batch_tile=1 keeps grid extent B (megacore-parallel), batch_tile=2 widens
    # the per-step MXU N.
    for tb in (1, 2):
        out = involution_forward(
            x, w1, b1, w2, b2,
            kernel_size=K, stride=S, padding=0, dilation=D, groups=G,
            batch_tile=tb, matmul_dtype=jnp.float32)
        out = jax.block_until_ready(out)
        assert out.shape == (B, C, H_out, W_out)
        err = float(jnp.abs(out - ref).max())
        assert jnp.allclose(out, ref, rtol=2e-3, atol=2e-3), (tb, err)

    # Default bf16-MXU path (kernel-generation matmul at full MXU rate); bf16
    # rounding of the small fused 1x1-conv is well inside 2e-2 at these scales.
    out_bf16 = involution_forward(
        x, w1, b1, w2, b2,
        kernel_size=K, stride=S, padding=0, dilation=D, groups=G,
        batch_tile=2)
    out_bf16 = jax.block_until_ready(out_bf16)
    assert out_bf16.shape == (B, C, H_out, W_out)
    err_bf = float(jnp.abs(out_bf16 - ref).max())
    assert jnp.allclose(out_bf16, ref, rtol=2e-2, atol=2e-2), err_bf

    print("KERNEL_OK")
</pallas_src>

<mosaic_0001>
module attributes {stable_mosaic.version = 11 : i64} {
  func.func @_involution_kernel_flat(%arg0: i32, %arg1: memref<1x8x324xf32, #tpu.memory_space<vmem>>, %arg2: memref<24x8xf32, #tpu.memory_space<vmem>>, %arg3: memref<24x1xf32, #tpu.memory_space<vmem>>, %arg4: memref<1x8x286xf32, #tpu.memory_space<vmem>>) attributes {dimension_semantics = [#tpu.dimension_semantics<parallel>], iteration_bounds = array<i64: 2>, scalar_prefetch = 0 : i64, scratch_operands = 0 : i64, tpu.core_type = #tpu.core_type<tc>, window_params = [{transform_indices = @transform_0, window_bounds = array<i64: 1, 8, 324>}, {pipeline_mode = #tpu.pipeline_mode<synchronous>, transform_indices = @transform_1, window_bounds = array<i64: 24, 8>}, {pipeline_mode = #tpu.pipeline_mode<synchronous>, transform_indices = @transform_2, window_bounds = array<i64: 24, 1>}, {transform_indices = @transform_3, window_bounds = array<i64: 1, 8, 286>}]} {
    %c0 = arith.constant 0 : index
    %c0_0 = arith.constant 0 : index
    %c19 = arith.constant 19 : index
    %0 = vector.load %arg1[%c0, %c0_0, %c19] : memref<1x8x324xf32, #tpu.memory_space<vmem>>, vector<1x8x286xf32>
    %1 = vector.shape_cast %0 : vector<1x8x286xf32> to vector<8x286xf32>
    %c0_1 = arith.constant 0 : index
    %c0_2 = arith.constant 0 : index
    %2 = vector.load %arg2[%c0_1, %c0_2] : memref<24x8xf32, #tpu.memory_space<vmem>>, vector<24x8xf32>
    %cst = arith.constant dense<0.000000e+00> : vector<24x286xf32>
    %3 = tpu.matmul %2, %1, %cst {dimension_numbers = #tpu.dot_dimension_numbers<[1], [0], [0], [1], [0, 0, 1, 1], [], []>} : vector<24x8xf32>, vector<8x286xf32>, vector<24x286xf32> -> vector<24x286xf32>
    %c0_3 = arith.constant 0 : index
    %c0_4 = arith.constant 0 : index
    %4 = vector.load %arg3[%c0_3, %c0_4] : memref<24x1xf32, #tpu.memory_space<vmem>>, vector<24x1xf32>
    %5 = vector.broadcast %4 : vector<24x1xf32> to vector<24x286xf32>
    %6 = arith.addf %3, %5 : vector<24x286xf32>
    %cst_5 = arith.constant 0.000000e+00 : f32
    %7 = vector.broadcast %cst_5 : f32 to vector<4x286xf32>
    %c0_6 = arith.constant 0 : index
    %c0_7 = arith.constant 0 : index
    %c0_8 = arith.constant 0 : index
    %8 = vector.load %arg1[%c0_6, %c0_7, %c0_8] : memref<1x8x324xf32, #tpu.memory_space<vmem>>, vector<1x4x286xf32>
    %9 = vector.shape_cast %8 : vector<1x4x286xf32> to vector<4x286xf32>
    %10 = vector.extract_strided_slice %6 {offsets = [0, 0], sizes = [1, 286], strides = [1, 1]} : vector<24x286xf32> to vector<1x286xf32>
    %11 = vector.broadcast %10 : vector<1x286xf32> to vector<4x286xf32>
    %12 = arith.mulf %9, %11 : vector<4x286xf32>
    %13 = arith.addf %7, %12 : vector<4x286xf32>
    %c0_9 = arith.constant 0 : index
    %c0_10 = arith.constant 0 : index
    %c1 = arith.constant 1 : index
    %14 = vector.load %arg1[%c0_9, %c0_10, %c1] : memref<1x8x324xf32, #tpu.memory_space<vmem>>, vector<1x4x286xf32>
    %15 = vector.shape_cast %14 : vector<1x4x286xf32> to vector<4x286xf32>
    %16 = vector.extract_strided_slice %6 {offsets = [1, 0], sizes = [1, 286], strides = [1, 1]} : vector<24x286xf32> to vector<1x286xf32>
    %17 = vector.broadcast %16 : vector<1x286xf32> to vector<4x286xf32>
    %18 = arith.mulf %15, %17 : vector<4x286xf32>
    %19 = arith.addf %13, %18 : vector<4x286xf32>
    %c0_11 = arith.constant 0 : index
    %c0_12 = arith.constant 0 : index
    %c2 = arith.constant 2 : index
    %20 = vector.load %arg1[%c0_11, %c0_12, %c2] : memref<1x8x324xf32, #tpu.memory_space<vmem>>, vector<1x4x286xf32>
    %21 = vector.shape_cast %20 : vector<1x4x286xf32> to vector<4x286xf32>
    %22 = vector.extract_strided_slice %6 {offsets = [2, 0], sizes = [1, 286], strides = [1, 1]} : vector<24x286xf32> to vector<1x286xf32>
    %23 = vector.broadcast %22 : vector<1x286xf32> to vector<4x286xf32>
    %24 = arith.mulf %21, %23 : vector<4x286xf32>
    %25 = arith.addf %19, %24 : vector<4x286xf32>
    %c0_13 = arith.constant 0 : index
    %c0_14 = arith.constant 0 : index
    %c18 = arith.constant 18 : index
    %26 = vector.load %arg1[%c0_13, %c0_14, %c18] : memref<1x8x324xf32, #tpu.memory_space<vmem>>, vector<1x4x286xf32>
    %27 = vector.shape_cast %26 : vector<1x4x286xf32> to vector<4x286xf32>
    %28 = vector.extract_strided_slice %6 {offsets = [3, 0], sizes = [1, 286], strides = [1, 1]} : vector<24x286xf32> to vector<1x286xf32>
    %29 = vector.broadcast %28 : vector<1x286xf32> to vector<4x286xf32>
    %30 = arith.mulf %27, %29 : vector<4x286xf32>
    %31 = arith.addf %25, %30 : vector<4x286xf32>
    %c0_15 = arith.constant 0 : index
    %c0_16 = arith.constant 0 : index
    %c19_17 = arith.constant 19 : index
    %32 = vector.load %arg1[%c0_15, %c0_16, %c19_17] : memref<1x8x324xf32, #tpu.memory_space<vmem>>, vector<1x4x286xf32>
    %33 = vector.shape_cast %32 : vector<1x4x286xf32> to vector<4x286xf32>
    %34 = vector.extract_strided_slice %6 {offsets = [4, 0], sizes = [1, 286], strides = [1, 1]} : vector<24x286xf32> to vector<1x286xf32>
    %35 = vector.broadcast %34 : vector<1x286xf32> to vector<4x286xf32>
    %36 = arith.mulf %33, %35 : vector<4x286xf32>
    %37 = arith.addf %31, %36 : vector<4x286xf32>
    %c0_18 = arith.constant 0 : index
    %c0_19 = arith.constant 0 : index
    %c20 = arith.constant 20 : index
    %38 = vector.load %arg1[%c0_18, %c0_19, %c20] : memref<1x8x324xf32, #tpu.memory_space<vmem>>, vector<1x4x286xf32>
    %39 = vector.shape_cast %38 : vector<1x4x286xf32> to vector<4x286xf32>
    %40 = vector.extract_strided_slice %6 {offsets = [5, 0], sizes = [1, 286], strides = [1, 1]} : vector<24x286xf32> to vector<1x286xf32>
    %41 = vector.broadcast %40 : vector<1x286xf32> to vector<4x286xf32>
    %42 = arith.mulf %39, %41 : vector<4x286xf32>
    %43 = arith.addf %37, %42 : vector<4x286xf32>
    %c0_20 = arith.constant 0 : index
    %c0_21 = arith.constant 0 : index
    %c36 = arith.constant 36 : index
    %44 = vector.load %arg1[%c0_20, %c0_21, %c36] : memref<1x8x324xf32, #tpu.memory_space<vmem>>, vector<1x4x286xf32>
    %45 = vector.shape_cast %44 : vector<1x4x286xf32> to vector<4x286xf32>
    %46 = vector.extract_strided_slice %6 {offsets = [6, 0], sizes = [1, 286], strides = [1, 1]} : vector<24x286xf32> to vector<1x286xf32>
    %47 = vector.broadcast %46 : vector<1x286xf32> to vector<4x286xf32>
    %48 = arith.mulf %45, %47 : vector<4x286xf32>
    %49 = arith.addf %43, %48 : vector<4x286xf32>
    %c0_22 = arith.constant 0 : index
    %c0_23 = arith.constant 0 : index
    %c37 = arith.constant 37 : index
    %50 = vector.load %arg1[%c0_22, %c0_23, %c37] : memref<1x8x324xf32, #tpu.memory_space<vmem>>, vector<1x4x286xf32>
    %51 = vector.shape_cast %50 : vector<1x4x286xf32> to vector<4x286xf32>
    %52 = vector.extract_strided_slice %6 {offsets = [7, 0], sizes = [1, 286], strides = [1, 1]} : vector<24x286xf32> to vector<1x286xf32>
    %53 = vector.broadcast %52 : vector<1x286xf32> to vector<4x286xf32>
    %54 = arith.mulf %51, %53 : vector<4x286xf32>
    %55 = arith.addf %49, %54 : vector<4x286xf32>
    %c0_24 = arith.constant 0 : index
    %c0_25 = arith.constant 0 : index
    %c38 = arith.constant 38 : index
    %56 = vector.load %arg1[%c0_24, %c0_25, %c38] : memref<1x8x324xf32, #tpu.memory_space<vmem>>, vector<1x4x286xf32>
    %57 = vector.shape_cast %56 : vector<1x4x286xf32> to vector<4x286xf32>
    %58 = vector.extract_strided_slice %6 {offsets = [8, 0], sizes = [1, 286], strides = [1, 1]} : vector<24x286xf32> to vector<1x286xf32>
    %59 = vector.broadcast %58 : vector<1x286xf32> to vector<4x286xf32>
    %60 = arith.mulf %57, %59 : vector<4x286xf32>
    %61 = arith.addf %55, %60 : vector<4x286xf32>
    %c0_26 = arith.constant 0 : index
    %c0_27 = arith.constant 0 : index
    %c0_28 = arith.constant 0 : index
    %62 = vector.load %arg4[%c0_26, %c0_27, %c0_28] : memref<1x8x286xf32, #tpu.memory_space<vmem>>, vector<1x4x286xf32>
    %63 = vector.shape_cast %62 : vector<1x4x286xf32> to vector<4x286xf32>
    %64 = vector.shape_cast %61 : vector<4x286xf32> to vector<1x4x286xf32>
    tpu.vector_store %arg4[%c0_26, %c0_27, %c0_28], %64 {strides = array<i32>} : memref<1x8x286xf32, #tpu.memory_space<vmem>>, vector<1x4x286xf32>,
    %cst_29 = arith.constant 0.000000e+00 : f32
    %65 = vector.broadcast %cst_29 : f32 to vector<4x286xf32>
    %c0_30 = arith.constant 0 : index
    %c4 = arith.constant 4 : index
    %c0_31 = arith.constant 0 : index
    %66 = vector.load %arg1[%c0_30, %c4, %c0_31] : memref<1x8x324xf32, #tpu.memory_space<vmem>>, vector<1x4x286xf32>
    %67 = vector.shape_cast %66 : vector<1x4x286xf32> to vector<4x286xf32>
    %68 = vector.extract_strided_slice %6 {offsets = [9, 0], sizes = [1, 286], strides = [1, 1]} : vector<24x286xf32> to vector<1x286xf32>
    %69 = vector.broadcast %68 : vector<1x286xf32> to vector<4x286xf32>
    %70 = arith.mulf %67, %69 : vector<4x286xf32>
    %71 = arith.addf %65, %70 : vector<4x286xf32>
    %c0_32 = arith.constant 0 : index
    %c4_33 = arith.constant 4 : index
    %c1_34 = arith.constant 1 : index
    %72 = vector.load %arg1[%c0_32, %c4_33, %c1_34] : memref<1x8x324xf32, #tpu.memory_space<vmem>>, vector<1x4x286xf32>
    %73 = vector.shape_cast %72 : vector<1x4x286xf32> to vector<4x286xf32>
    %74 = vector.extract_strided_slice %6 {offsets = [10, 0], sizes = [1, 286], strides = [1, 1]} : vector<24x286xf32> to vector<1x286xf32>
    %75 = vector.broadcast %74 : vector<1x286xf32> to vector<4x286xf32>
    %76 = arith.mulf %73, %75 : vector<4x286xf32>
    %77 = arith.addf %71, %76 : vector<4x286xf32>
    %c0_35 = arith.constant 0 : index
    %c4_36 = arith.constant 4 : index
    %c2_37 = arith.constant 2 : index
    %78 = vector.load %arg1[%c0_35, %c4_36, %c2_37] : memref<1x8x324xf32, #tpu.memory_space<vmem>>, vector<1x4x286xf32>
    %79 = vector.shape_cast %78 : vector<1x4x286xf32> to vector<4x286xf32>
    %80 = vector.extract_strided_slice %6 {offsets = [11, 0], sizes = [1, 286], strides = [1, 1]} : vector<24x286xf32> to vector<1x286xf32>
    %81 = vector.broadcast %80 : vector<1x286xf32> to vector<4x286xf32>
    %82 = arith.mulf %79, %81 : vector<4x286xf32>
    %83 = arith.addf %77, %82 : vector<4x286xf32>
    %c0_38 = arith.constant 0 : index
    %c4_39 = arith.constant 4 : index
    %c18_40 = arith.constant 18 : index
    %84 = vector.load %arg1[%c0_38, %c4_39, %c18_40] : memref<1x8x324xf32, #tpu.memory_space<vmem>>, vector<1x4x286xf32>
    %85 = vector.shape_cast %84 : vector<1x4x286xf32> to vector<4x286xf32>
    %86 = vector.extract_strided_slice %6 {offsets = [12, 0], sizes = [1, 286], strides = [1, 1]} : vector<24x286xf32> to vector<1x286xf32>
    %87 = vector.broadcast %86 : vector<1x286xf32> to vector<4x286xf32>
    %88 = arith.mulf %85, %87 : vector<4x286xf32>
    %89 = arith.addf %83, %88 : vector<4x286xf32>
    %c0_41 = arith.constant 0 : index
    %c4_42 = arith.constant 4 : index
    %c19_43 = arith.constant 19 : index
    %90 = vector.load %arg1[%c0_41, %c4_42, %c19_43] : memref<1x8x324xf32, #tpu.memory_space<vmem>>, vector<1x4x286xf32>
    %91 = vector.shape_cast %90 : vector<1x4x286xf32> to vector<4x286xf32>
    %92 = vector.extract_strided_slice %6 {offsets = [13, 0], sizes = [1, 286], strides = [1, 1]} : vector<24x286xf32> to vector<1x286xf32>
    %93 = vector.broadcast %92 : vector<1x286xf32> to vector<4x286xf32>
    %94 = arith.mulf %91, %93 : vector<4x286xf32>
    %95 = arith.addf %89, %94 : vector<4x286xf32>
    %c0_44 = arith.constant 0 : index
    %c4_45 = arith.constant 4 : index
    %c20_46 = arith.constant 20 : index
    %96 = vector.load %arg1[%c0_44, %c4_45, %c20_46] : memref<1x8x324xf32, #tpu.memory_space<vmem>>, vector<1x4x286xf32>
    %97 = vector.shape_cast %96 : vector<1x4x286xf32> to vector<4x286xf32>
    %98 = vector.extract_strided_slice %6 {offsets = [14, 0], sizes = [1, 286], strides = [1, 1]} : vector<24x286xf32> to vector<1x286xf32>
    %99 = vector.broadcast %98 : vector<1x286xf32> to vector<4x286xf32>
    %100 = arith.mulf %97, %99 : vector<4x286xf32>
    %101 = arith.addf %95, %100 : vector<4x286xf32>
    %c0_47 = arith.constant 0 : index
    %c4_48 = arith.constant 4 : index
    %c36_49 = arith.constant 36 : index
    %102 = vector.load %arg1[%c0_47, %c4_48, %c36_49] : memref<1x8x324xf32, #tpu.memory_space<vmem>>, vector<1x4x286xf32>
    %103 = vector.shape_cast %102 : vector<1x4x286xf32> to vector<4x286xf32>
    %104 = vector.extract_strided_slice %6 {offsets = [15, 0], sizes = [1, 286], strides = [1, 1]} : vector<24x286xf32> to vector<1x286xf32>
    %105 = vector.broadcast %104 : vector<1x286xf32> to vector<4x286xf32>
    %106 = arith.mulf %103, %105 : vector<4x286xf32>
    %107 = arith.addf %101, %106 : vector<4x286xf32>
    %c0_50 = arith.constant 0 : index
    %c4_51 = arith.constant 4 : index
    %c37_52 = arith.constant 37 : index
    %108 = vector.load %arg1[%c0_50, %c4_51, %c37_52] : memref<1x8x324xf32, #tpu.memory_space<vmem>>, vector<1x4x286xf32>
    %109 = vector.shape_cast %108 : vector<1x4x286xf32> to vector<4x286xf32>
    %110 = vector.extract_strided_slice %6 {offsets = [16, 0], sizes = [1, 286], strides = [1, 1]} : vector<24x286xf32> to vector<1x286xf32>
    %111 = vector.broadcast %110 : vector<1x286xf32> to vector<4x286xf32>
    %112 = arith.mulf %109, %111 : vector<4x286xf32>
    %113 = arith.addf %107, %112 : vector<4x286xf32>
    %c0_53 = arith.constant 0 : index
    %c4_54 = arith.constant 4 : index
    %c38_55 = arith.constant 38 : index
    %114 = vector.load %arg1[%c0_53, %c4_54, %c38_55] : memref<1x8x324xf32, #tpu.memory_space<vmem>>, vector<1x4x286xf32>
    %115 = vector.shape_cast %114 : vector<1x4x286xf32> to vector<4x286xf32>
    %116 = vector.extract_strided_slice %6 {offsets = [17, 0], sizes = [1, 286], strides = [1, 1]} : vector<24x286xf32> to vector<1x286xf32>
    %117 = vector.broadcast %116 : vector<1x286xf32> to vector<4x286xf32>
    %118 = arith.mulf %115, %117 : vector<4x286xf32>
    %119 = arith.addf %113, %118 : vector<4x286xf32>
    %c0_56 = arith.constant 0 : index
    %c4_57 = arith.constant 4 : index
    %c0_58 = arith.constant 0 : index
    %120 = vector.load %arg4[%c0_56, %c4_57, %c0_58] : memref<1x8x286xf32, #tpu.memory_space<vmem>>, vector<1x4x286xf32>
    %121 = vector.shape_cast %120 : vector<1x4x286xf32> to vector<4x286xf32>
    %122 = vector.shape_cast %119 : vector<4x286xf32> to vector<1x4x286xf32>
    tpu.vector_store %arg4[%c0_56, %c4_57, %c0_58], %122 {strides = array<i32>} : memref<1x8x286xf32, #tpu.memory_space<vmem>>, vector<1x4x286xf32>,
    return
  }
  func.func @transform_0(%arg0: i32) -> (i32, i32, i32) {
    %c0_i32 = arith.constant 0 : i32
    %c0_i32_0 = arith.constant 0 : i32
    %c0_i32_1 = arith.constant 0 : i32
    return %arg0, %c0_i32, %c0_i32_0 : i32, i32, i32
  }
  func.func @transform_1(%arg0: i32) -> (i32, i32) {
    %c0_i32 = arith.constant 0 : i32
    %c0_i32_0 = arith.constant 0 : i32
    %c0_i32_1 = arith.constant 0 : i32
    return %c0_i32, %c0_i32_0 : i32, i32
  }
  func.func @transform_2(%arg0: i32) -> (i32, i32) {
    %c0_i32 = arith.constant 0 : i32
    %c0_i32_0 = arith.constant 0 : i32
    %c0_i32_1 = arith.constant 0 : i32
    return %c0_i32, %c0_i32_0 : i32, i32
  }
  func.func @transform_3(%arg0: i32) -> (i32, i32, i32) {
    %c0_i32 = arith.constant 0 : i32
    %c0_i32_0 = arith.constant 0 : i32
    %c0_i32_1 = arith.constant 0 : i32
    return %arg0, %c0_i32, %c0_i32_0 : i32, i32, i32
  }
}

</mosaic_0001>

<bundles_post_ra>
// kernel: tpu_custom_call.1
= control target key start
LH: loop header
LB: loop body
LE: loop exit
PB: predicated region body
PF: predicated region fallthrough
CT: control target
= control target key end

     0   :  { %8 = vsyncpa [#allocation3], 0  ;;  %s1642_s0 = inlined_call_operand.vmem [shape: f32[2,8,324], index: 0, kind: input, shape index: {}]   ;;  %s1643_s1 = inlined_call_operand.vmem [shape: f32[24,8], index: 1, kind: input, shape index: {}]   ;;  %s1644_s2 = inlined_call_operand.vmem [shape: f32[24,1], index: 2, kind: input, shape index: {}]   ;;  %s1645_s3 = inlined_call_operand.hbm [shape: f32[2,8,286], index: 3, kind: output, shape index: {}]  }
   0x1   :  { %10 = vsyncpa [#allocation3 + $0x1], 0  ;;  %s1196_s12 = smov 0   ;;  %s1198_s13 = smov 0  }
   0x2   :  { %s1200_s14 = smov 0   ;;  %s1202_s15 = smov 0  }
   0x3 LB: > { %s1217_s16 = sadd.s32 4294967295, %s1157_s15   ;;  %s1011_s17 = sadd.s32 4294967294, %s1157_s15   ;;  %s1157_s15 = sphi %s1202_s15, %s1651_s15   ;;  %s1153_s14 = sphi %s1200_s14, %s1650_s14   ;;  %s1149_s13 = sphi %s1198_s13, %s1649_s13   ;;  %s1145_s12 = sphi %s1196_s12, %s1648_s12  }
   0x4   : > { %s1221_s18 = sadd.s32 1, %s1157_s15   ;;  %s91_s19 = sadd.s32 1, %s1153_s14 }
   0x5   : > { %s88_s20 = ssub.s32 %s1157_s15, %s1221_s18  ;;  %p101_p0 = scmp.ne.s32.totalorder %s1153_s14, %s1149_s13 }
   0x6   : > { %p89_p1 = scmp.eq.s32.totalorder %s88_s20, 0  ;;  %p102_p2 = scmp.eq.s32.totalorder %s1217_s16, 1 }
   0x7   : > { %p107_p3 = scmp.ne.s32.totalorder %s1149_s13, %s1145_s12  ;;  %p108_p4 = scmp.eq.s32.totalorder %s1011_s17, 1 }
   0x8   : > { %s1232_s21 = scalar_select %p89_p1, %s1153_s14, %s91_s19  }
   0x9   : > { %p1234_p5 = por %p102_p2, %p101_p0  ;;  %p1238_p6 = por %p108_p4, %p107_p3 }
   0xa   : > { %p1014_p7 = scmp.ge.s32.totalorder %s1157_s15, 1  ;;  %p140_p8 = scmp.lt.s32.totalorder %s1157_s15, 3 }
   0xc   : > { %p141_p9 = pnand %p1014_p7, %p140_p8 }
   0xd   : > { %p164_p10 = scmp.lt.s32.totalorder (!%p141_p9), %s1217_s16, 1  ;;  %s1160_s4 = smov (!%p141_p9), 109  }
   0xe   : > { %144 = sbr.rel (%p141_p9) target bundleno = 649 (0x289), region = 32  ;;  %s1161_s24 = smov (!%p141_p9), 1  }
   0xf   : > { %s1162_s25 = smov (!%p141_p9), 2   ;;  %s1165_s28 = smov (!%p141_p9), 20  }
  0x10   : > { %s1166_s29 = smov (!%p141_p9), 36   ;;  %s1167_s5 = smov (!%p141_p9), 37  }
  0x11   : > { %s1168_s6 = smov (!%p141_p9), 38   ;;  %s1169_s7 = smov (!%p141_p9), 127  }
  0x12   : > { %s1170_s8 = smov (!%p141_p9), 126   ;;  %s1171_s9 = smov (!%p141_p9), 110  }
  0x13   : > { %v177_v0 = vld [vmem:[%s1644_s2 + $0x10] sm:$0xff]  ;;  %v1159_v1 = vmov 0   ;;  %s165_s26 = scalar_select %p164_p10, %s1217_s16, 1  ;;  %v175_v6 = vld [vmem:[%s1644_s2] sm:$0xff]  ;;  %v176_v7 = vld [vmem:[%s1644_s2 + $0x8] sm:$0xff]  ;;  %vm208_vm0 = vcmask 64512  }
  0x14   : > { %1089 = vset.pattern.permute.xlu1 %v1159_v1  ;;  %1088 = vset.pattern.permute.xlu0 %v1159_v1  ;;  %v172_v8 = vld [vmem:[%s1643_s1] sm:$0xff]  ;;  %v173_v10 = vld [vmem:[%s1643_s1 + $0x8] sm:$0xff]  ;;  %v174_v11 = vld [vmem:[%s1643_s1 + $0x10] sm:$0xff]  ;;  %vm202_vm1 = vcmask 891904   ;;  %vm320_vm2 = vcmask 7168   ;;  %vm359_vm3 = vcmask 15360  }
  0x15   : > { %190 = vperm.xlu1 %1089, %v177_v0   ;;  %s1030_s27 = smul.u32 24, %s165_s26  ;;  %180 = vperm.xlu0 %1088, %v175_v6   ;;  %s1163_s26 = smov 18   ;;  %vm398_vm4 = vcmask 146432   ;;  %vm437_vm5 = vcmask 154624   ;;  %vm475_vm6 = vcmask 162816   ;;  %vm514_vm7 = vcmask 293888  }
  0x16   : > { %s1172_s10 = smov 108   ;;  %s1173_s11 = smov 92   ;;  %vm553_vm8 = vcmask 302080   ;;  %vm592_vm9 = vcmask 310272   ;;  %vm338_vm10 = vcmask 1039360   ;;  %vm377_vm11 = vcmask 1031168  }
  0x17   : > { %s1252_s30 = scalar_lea.vmem %s1642_s0, %s1030_s27  ;;  %s1164_s27 = smov 19   ;;  %vm416_vm12 = vcmask 900096   ;;  %vm493_vm13 = vcmask 883712   ;;  %vm621_vm14 = vcmask 240640   ;;  %vm532_vm15 = vcmask 752640  }
  0x18   : > { %v171_v2 = vld [vmem:[%s1252_s30 + $0x10] sm:$0xff]  ;;  %v169_v3 = vld [vmem:[%s1252_s30] sm:$0xff]  ;;  %v170_v4 = vld [vmem:[%s1252_s30 + $0x8] sm:$0xff]  ;;  %s1174_s17 = smov 91   ;;  %s1175_s19 = smov 90  }
  0x19   : > { %200 = vrot.lane.b32.xlu2 %v171_v2, %s1160_s4  ;;  %v1090_v5 = vpack.i.bf16 %v170_v4, %v169_v3 }
  0x1d   : > { %1091 = vrot.lane.b32.xlu1 %v1090_v5, %s1160_s4  ;;  %185 = vperm.xlu0 %1088, %v176_v7  }
  0x73   : > { %v201_v9 = vpop.permute.xlu2 %200 }
  0x74   : > { %285 = vmatpush.msra.mxu2 %v201_v9 }
  0x75   : > { %1022 = vmatmul.msk.f32.vlgmr.msra.gmra.mxu2 %vm208_vm0, %v172_v8 }
  0x7d   : > { %1023 = vmatmul.msk.f32.gmra.mxu2 %vm208_vm0, %v173_v10 }
  0x85   : > { %1024 = vmatmul.msk.f32.gmra.mxu2 %vm208_vm0, %v174_v11 }
  0x87   : > { %v1276_v12 = vpop.permute.xlu1 %190  ;;  %v181_v18 = vpop.permute.xlu0 %180 }
  0x8f   : > { %v1092_v13 = vpop.permute.xlu1 %1091  ;;  %v186_v41 = vpop.permute.xlu0 %185 }
  0x90   : > { %v1094_v14 = vunpack.i.h.bf16 %v1092_v13  ;;  %v1093_v15 = vunpack.i.l.bf16 %v1092_v13 }
  0x92   : > { %v203_v16 = vsel %vm202_vm1, %v1093_v15, %v1094_v14  ;;  %v204_v17 = vsel %vm202_vm1, %v1094_v14, %v201_v9 }
  0x93   : > { %233 = vmatpush.msra.mxu0 %v203_v16  ;;  %1028 = vmatpush.msra.mxu3 %v203_v16 }
  0x94   : > { %259 = vmatpush.msra.mxu1 %v204_v17  ;;  %1016 = vmatmul.msk.f32.vlgmr.msra.gmra.mxu0 %vm208_vm0, %v172_v8 }
  0x95   : > { %1017 = vmatmul.msk.f32.vlgmr.msra.gmra.mxu3 %vm208_vm0, %v173_v10  ;;  %1019 = vmatmul.msk.f32.vlgmr.msra.gmra.mxu1 %vm208_vm0, %v172_v8 }
  0x9d   : > { %1018 = vmatmul.msk.f32.gmra.mxu3 %vm208_vm0, %v174_v11  ;;  %1020 = vmatmul.msk.f32.gmra.mxu1 %vm208_vm0, %v173_v10 }
  0xa5   : > { %1021 = vmatmul.msk.f32.gmra.mxu1 %vm208_vm0, %v174_v11  ;;  %vm571_vm0 = vcmask 744448  }
  0xf8   : > { %v287_v19 = vpop.f32.mrf.mxu2 }
  0xf9   : > { %v1287_v20 = vadd.f32 %v287_v19, %v181_v18 }
  0xfb   : > { %v310_v21 = vperm.slane %v1287_v20, 1  ;;  %v349_v22 = vperm.slane %v1287_v20, 2  ;;  %v388_v23 = vperm.slane %v1287_v20, 3  ;;  %v427_v30 = vperm.slane %v1287_v20, 4 }
  0xfc   : > { %v465_v33 = vperm.slane %v1287_v20, 5  ;;  %v504_v36 = vperm.slane %v1287_v20, 6  ;;  %v543_v39 = vperm.slane %v1287_v20, 7 }
  0xfd   : > { %318 = vrot.lane.b32.xlu1 %v310_v21, %s1161_s24 }
 0x100   : > { %v290_v52 = vpop.f32.mrf.mxu2 }
 0x101   : > { %v1343_v54 = vadd.f32 %v290_v52, %v186_v41 }
 0x103   : > { %v582_v58 = vperm.slane %v1343_v54, 0  ;;  %v637_v61 = vperm.slane %v1343_v54, 2  ;;  %v674_v0 = vperm.slane %v1343_v54, 3  ;;  %v711_v3 = vperm.slane %v1343_v54, 4 }
 0x104   : > { %v748_v8 = vperm.slane %v1343_v54, 5  ;;  %v785_v14 = vperm.slane %v1343_v54, 6  ;;  %v822_v19 = vperm.slane %v1343_v54, 7 }
 0x105   : > { %357 = vrot.lane.b32.xlu1 %v349_v22, %s1162_s25 }
 0x108   : > { %v293_v21 = vpop.f32.mrf.mxu2 }
 0x10d   : > { %396 = vrot.lane.b32.xlu1 %v388_v23, %s1163_s26 }
 0x111   : > { %v235_v24 = vpop.f32.mrf.mxu0 }
 0x112   : > { %v1295_v25 = vadd.f32 %v235_v24, %v181_v18  ;;  %v261_v26 = vpop.f32.mrf.mxu1  ;;  %v294_v24 = vadd.f32 %v293_v21, %v1276_v12 }
 0x113   : > { %v1297_v27 = vadd.f32 %v261_v26, %v181_v18 }
 0x114   : > { %v308_v28 = vperm.slane %v1295_v25, 1  ;;  %v347_v31 = vperm.slane %v1295_v25, 2  ;;  %v386_v34 = vperm.slane %v1295_v25, 3  ;;  %v425_v37 = vperm.slane %v1295_v25, 4 }
 0x115   : > { %v309_v29 = vperm.slane %v1297_v27, 1  ;;  %435 = vrot.lane.b32.xlu1 %v427_v30, %s1164_s27  ;;  %v348_v32 = vperm.slane %v1297_v27, 2  ;;  %v387_v35 = vperm.slane %v1297_v27, 3  ;;  %v426_v38 = vperm.slane %v1297_v27, 4 }
 0x116   : > { %314 = vrot.lane.b32.xlu2 %v308_v28, %s1161_s24  ;;  %v463_v43 = vperm.slane %v1295_v25, 5  ;;  %v464_v44 = vperm.slane %v1297_v27, 5  ;;  %v502_v46 = vperm.slane %v1295_v25, 6  ;;  %v503_v47 = vperm.slane %v1297_v27, 6 }
 0x117   : > { %316 = vrot.lane.b32.xlu0 %v309_v29, %s1161_s24  ;;  %v541_v49 = vperm.slane %v1295_v25, 7  ;;  %v542_v50 = vperm.slane %v1297_v27, 7  ;;  %v859_v29 = vperm.slane %v294_v24, 0 }
 0x118   : > { %v238_v40 = vpop.f32.mrf.mxu3 }
 0x119   : > { %v1323_v42 = vadd.f32 %v238_v40, %v186_v41 }
 0x11a   : > { %v264_v53 = vpop.f32.mrf.mxu1 }
 0x11b   : > { %v746_v45 = vperm.slane %v1323_v42, 5  ;;  %v783_v48 = vperm.slane %v1323_v42, 6  ;;  %v820_v51 = vperm.slane %v1323_v42, 7  ;;  %v1345_v55 = vadd.f32 %v264_v53, %v186_v41 }
 0x11c   : > { %v580_v56 = vperm.slane %v1323_v42, 0  ;;  %v635_v59 = vperm.slane %v1323_v42, 2  ;;  %v672_v62 = vperm.slane %v1323_v42, 3  ;;  %v709_v1 = vperm.slane %v1323_v42, 4 }
 0x11d   : > { %473 = vrot.lane.b32.xlu1 %v465_v33, %s1165_s28  ;;  %v581_v57 = vperm.slane %v1345_v55, 0  ;;  %v636_v60 = vperm.slane %v1345_v55, 2  ;;  %v673_v63 = vperm.slane %v1345_v55, 3  ;;  %v710_v2 = vperm.slane %v1345_v55, 4  ;;  %v1391_v33 = vld [vmem:[%s1252_s30 + $0x10] sm:$0xf] }
 0x11e   : > { %353 = vrot.lane.b32.xlu2 %v347_v31, %s1162_s25  ;;  %v747_v6 = vperm.slane %v1345_v55, 5  ;;  %v784_v11 = vperm.slane %v1345_v55, 6  ;;  %v821_v17 = vperm.slane %v1345_v55, 7 }
 0x11f   : > { %355 = vrot.lane.b32.xlu0 %v348_v32, %s1162_s25 }
 0x120   : > { %v241_v4 = vpop.f32.mrf.mxu3 }
 0x121   : > { %v242_v5 = vadd.f32 %v241_v4, %v1276_v12 }
 0x122   : > { %v267_v18 = vpop.f32.mrf.mxu1 }
 0x123   : > { %v857_v7 = vperm.slane %v242_v5, 0  ;;  %v894_v13 = vperm.slane %v242_v5, 1  ;;  %v268_v22 = vadd.f32 %v267_v18, %v1276_v12 }
 0x125   : > { %512 = vrot.lane.b32.xlu1 %v504_v36, %s1166_s29  ;;  %v858_v28 = vperm.slane %v268_v22, 0  ;;  %v895_v12 = vperm.slane %v268_v22, 1  ;;  %v896_v36 = vperm.slane %v294_v24, 1 }
 0x126   : > { %392 = vrot.lane.b32.xlu2 %v386_v34, %s1163_s26 }
 0x127   : > { %394 = vrot.lane.b32.xlu0 %v387_v35, %s1163_s26 }
 0x12d   : > { %551 = vrot.lane.b32.xlu1 %v543_v39, %s1167_s5 }
 0x12e   : > { %431 = vrot.lane.b32.xlu2 %v425_v37, %s1164_s27 }
 0x12f   : > { %433 = vrot.lane.b32.xlu0 %v426_v38, %s1164_s27 }
 0x135   : > { %752 = vrot.lane.b32.xlu1 %v746_v45, %s1164_s27 }
 0x136   : > { %469 = vrot.lane.b32.xlu2 %v463_v43, %s1165_s28  ;;  %v1401_v43 = vld [vmem:[%s1252_s30] sm:$0xf] }
 0x137   : > { %471 = vrot.lane.b32.xlu0 %v464_v44, %s1165_s28 }
 0x13d   : > { %789 = vrot.lane.b32.xlu1 %v783_v48, %s1165_s28 }
 0x13e   : > { %508 = vrot.lane.b32.xlu2 %v502_v46, %s1166_s29  ;;  %v1406_v46 = vld [vmem:[%s1252_s30 + $0x8] sm:$0xf] }
 0x13f   : > { %510 = vrot.lane.b32.xlu0 %v503_v47, %s1166_s29 }
 0x145   : > { %826 = vrot.lane.b32.xlu1 %v820_v51, %s1166_s29 }
 0x146   : > { %547 = vrot.lane.b32.xlu2 %v541_v49, %s1167_s5 }
 0x147   : > { %549 = vrot.lane.b32.xlu0 %v542_v50, %s1167_s5 }
 0x14d   : > { %590 = vrot.lane.b32.xlu1 %v582_v58, %s1168_s6 }
 0x14e   : > { %586 = vrot.lane.b32.xlu2 %v580_v56, %s1168_s6 }
 0x14f   : > { %588 = vrot.lane.b32.xlu0 %v581_v57, %s1168_s6 }
 0x155   : > { %645 = vrot.lane.b32.xlu1 %v637_v61, %s1161_s24 }
 0x156   : > { %641 = vrot.lane.b32.xlu2 %v635_v59, %s1161_s24 }
 0x157   : > { %643 = vrot.lane.b32.xlu0 %v636_v60, %s1161_s24  ;;  %s1031_s24 = smul.u32 24, %s1217_s16 }
 0x15d   : > { %682 = vrot.lane.b32.xlu1 %v674_v0, %s1162_s25 }
 0x15e   : > { %678 = vrot.lane.b32.xlu2 %v672_v62, %s1162_s25 }
 0x15f   : > { %680 = vrot.lane.b32.xlu0 %v673_v63, %s1162_s25 }
 0x165   : > { %719 = vrot.lane.b32.xlu1 %v711_v3, %s1163_s26 }
 0x166   : > { %715 = vrot.lane.b32.xlu2 %v709_v1, %s1163_s26 }
 0x167   : > { %717 = vrot.lane.b32.xlu0 %v710_v2, %s1163_s26 }
 0x16d   : > { %863 = vrot.lane.b32.xlu1 %v857_v7, %s1167_s5 }
 0x16e   : > { %754 = vrot.lane.b32.xlu2 %v747_v6, %s1164_s27 }
 0x16f   : > { %756 = vrot.lane.b32.xlu0 %v748_v8, %s1164_s27  ;;  %v319_v10 = vpop.permute.xlu1 %318  ;;  %s947_s27 = scalar_lea.hbm %s1645_s3, %s1031_s24 }
 0x170   : > { %v315_v9 = vpop.permute.xlu2 %314 }
 0x171   : > { %v326_v45 = vmul.f32 %v315_v9, %v1401_v43 }
 0x175   : > { %900 = vrot.lane.b32.xlu1 %v894_v13, %s1168_s6 }
 0x176   : > { %791 = vrot.lane.b32.xlu2 %v784_v11, %s1165_s28 }
 0x177   : > { %793 = vrot.lane.b32.xlu0 %v785_v14, %s1165_s28  ;;  %v358_v16 = vpop.permute.xlu1 %357 }
 0x178   : > { %v354_v15 = vpop.permute.xlu2 %353 }
 0x179   : > { %v365_v56 = vmul.f32 %v354_v15, %v1401_v43 }
 0x17e   : > { %828 = vrot.lane.b32.xlu2 %v821_v17, %s1166_s29 }
 0x17f   : > { %830 = vrot.lane.b32.xlu0 %v822_v19, %s1166_s29  ;;  %v397_v26 = vpop.permute.xlu1 %396  ;;  %s951_s29 = sshll.u32 %s947_s27, 4  ;;  %s952_s29 = int_to_ptr.hbm [resolvable:$true] %s951_s29 }
 0x180   : > { %v393_v23 = vpop.permute.xlu2 %392 }
 0x181   : > { %v404_v0 = vmul.f32 %v393_v23, %v1401_v43 }
 0x186   : > { %865 = vrot.lane.b32.xlu2 %v858_v28, %s1167_s5 }
 0x187   : > { %867 = vrot.lane.b32.xlu0 %v859_v29, %s1167_s5  ;;  %v436_v32 = vpop.permute.xlu1 %435  ;;  %s1109_s5 = sshra.s32 %s952_s29, 4  ;;  %s1110_s5 = int_to_ptr.hbm [resolvable:$true] %s1109_s5 }
 0x188   : > { %v432_v30 = vpop.permute.xlu2 %431  ;;  %p1116_p0 = scmp.lt.s32.totalorder %s1110_s5, %s1645_s3 }
 0x189   : > { %v317_v31 = vpop.permute.xlu0 %316  ;;  %v443_v8 = vmul.f32 %v432_v30, %v1401_v43 }
 0x18a   : > { %v322_v34 = vsel %vm320_vm2, %v317_v31, %v319_v10  ;;  %v321_v40 = vsel %vm320_vm2, %v315_v9, %v317_v31 }
 0x18b   : > { %v328_v35 = vmul.f32 %v322_v34, %v1391_v33  ;;  %v327_v47 = vmul.f32 %v321_v40, %v1406_v46 }
 0x18d   : > { %336 = vrot.lane.b32.xlu1 %v328_v35, %s1169_s7 }
 0x18e   : > { %902 = vrot.lane.b32.xlu2 %v895_v12, %s1168_s6 }
 0x18f   : > { %904 = vrot.lane.b32.xlu0 %v896_v36, %s1168_s6  ;;  %v474_v39 = vpop.permute.xlu1 %473  ;;  %s1111_s6 = scalar_lea.hbm %s1110_s5, 24 }
 0x190   : > { %v470_v37 = vpop.permute.xlu2 %469  ;;  %p1112_p11 = scmp.ne.s32.totalorder %s1110_s5, %s1111_s6 }
 0x191   : > { %v356_v38 = vpop.permute.xlu0 %355  ;;  %v481_v17 = vmul.f32 %v470_v37, %v1401_v43 }
 0x192   : > { %v361_v41 = vsel %vm359_vm3, %v356_v38, %v358_v16  ;;  %v360_v51 = vsel %vm359_vm3, %v354_v15, %v356_v38  ;;  %p1113_p12 = pnand %p1112_p11, %p1234_p5 }
 0x193   : > { %v367_v44 = vmul.f32 %v361_v41, %v1391_v33  ;;  %v366_v57 = vmul.f32 %v360_v51, %v1406_v46 }
 0x194   : > { %p1114_p13 = pneg %p1113_p12 }
 0x195   : > { %375 = vrot.lane.b32.xlu1 %v367_v44, %s1170_s8 }
 0x196   : > { %332 = vrot.lane.b32.xlu2 %v326_v45, %s1169_s7  ;;  %v1470_v45 = vld [vmem:[%s1252_s30 + $0x10] sm:$0xf0] }
 0x197   : > { %334 = vrot.lane.b32.xlu0 %v327_v47, %s1169_s7  ;;  %v513_v50 = vpop.permute.xlu1 %512 }
 0x198   : > { %v509_v48 = vpop.permute.xlu2 %508 }
 0x199   : > { %v395_v49 = vpop.permute.xlu0 %394  ;;  %v520_v28 = vmul.f32 %v509_v48, %v1401_v43 }
 0x19a   : > { %v400_v52 = vsel %vm398_vm4, %v395_v49, %v397_v26  ;;  %v399_v61 = vsel %vm398_vm4, %v393_v23, %v395_v49 }
 0x19b   : > { %v406_v53 = vmul.f32 %v400_v52, %v1391_v33  ;;  %v405_v1 = vmul.f32 %v399_v61, %v1406_v46 }
 0x19d   : > { %414 = vrot.lane.b32.xlu1 %v406_v53, %s1171_s9 }
 0x19e   : > { %371 = vrot.lane.b32.xlu2 %v365_v56, %s1170_s8 }
 0x19f   : > { %373 = vrot.lane.b32.xlu0 %v366_v57, %s1170_s8  ;;  %v552_v60 = vpop.permute.xlu1 %551 }
 0x1a0   : > { %v548_v58 = vpop.permute.xlu2 %547 }
 0x1a1   : > { %v434_v59 = vpop.permute.xlu0 %433  ;;  %v559_v36 = vmul.f32 %v548_v58, %v1401_v43 }
 0x1a2   : > { %v439_v62 = vsel %vm437_vm5, %v434_v59, %v436_v32  ;;  %v438_v5 = vsel %vm437_vm5, %v432_v30, %v434_v59  ;;  %v1484_v59 = vld [vmem:[%s1252_s30] sm:$0xf0] }
 0x1a3   : > { %v445_v63 = vmul.f32 %v439_v62, %v1391_v33  ;;  %v444_v9 = vmul.f32 %v438_v5, %v1406_v46  ;;  %v1489_v62 = vld [vmem:[%s1252_s30 + $0x8] sm:$0xf0]  ;;  %s161_s30 = sand.u32 1, %s1149_s13  }
 0x1a4   : > { %s936_s16 = scalar_lea.sflag [#allocation3], %s161_s30 }
 0x1a5   : > { %453 = vrot.lane.b32.xlu1 %v445_v63, %s1160_s4 }
 0x1a6   : > { %410 = vrot.lane.b32.xlu2 %v404_v0, %s1171_s9 }
 0x1a7   : > { %412 = vrot.lane.b32.xlu0 %v405_v1, %s1171_s9  ;;  %v1428_v4 = vpop.permute.xlu1 %752 }
 0x1a8   : > { %v587_v2 = vpop.permute.xlu2 %586 }
 0x1a9   : > { %v472_v3 = vpop.permute.xlu0 %471  ;;  %v598_v49 = vmul.f32 %v587_v2, %v1401_v43 }
 0x1aa   : > { %v477_v6 = vsel %vm475_vm6, %v472_v3, %v474_v39  ;;  %v476_v14 = vsel %vm475_vm6, %v470_v37, %v472_v3 }
 0x1ab   : > { %v483_v7 = vmul.f32 %v477_v6, %v1391_v33  ;;  %v482_v18 = vmul.f32 %v476_v14, %v1406_v46 }
 0x1ad   : > { %491 = vrot.lane.b32.xlu1 %v483_v7, %s1172_s10 }
 0x1ae   : > { %449 = vrot.lane.b32.xlu2 %v443_v8, %s1160_s4 }
 0x1af   : > { %451 = vrot.lane.b32.xlu0 %v444_v9, %s1160_s4  ;;  %v1438_v13 = vpop.permute.xlu1 %789 }
 0x1b0   : > { %v642_v10 = vpop.permute.xlu2 %641 }
 0x1b1   : > { %v511_v11 = vpop.permute.xlu0 %510  ;;  %v652_v61 = vmul.f32 %v642_v10, %v1484_v59 }
 0x1b2   : > { %v516_v15 = vsel %vm514_vm7, %v511_v11, %v513_v50  ;;  %v515_v23 = vsel %vm514_vm7, %v509_v48, %v511_v11 }
 0x1b3   : > { %v522_v16 = vmul.f32 %v516_v15, %v1391_v33  ;;  %v521_v29 = vmul.f32 %v515_v23, %v1406_v46 }
 0x1b5   : > { %530 = vrot.lane.b32.xlu1 %v522_v16, %s1173_s11 }
 0x1b6   : > { %487 = vrot.lane.b32.xlu2 %v481_v17, %s1172_s10 }
 0x1b7   : > { %489 = vrot.lane.b32.xlu0 %v482_v18, %s1172_s10  ;;  %v1448_v22 = vpop.permute.xlu1 %826 }
 0x1b8   : > { %v679_v19 = vpop.permute.xlu2 %678 }
 0x1b9   : > { %v550_v21 = vpop.permute.xlu0 %549  ;;  %v689_v8 = vmul.f32 %v679_v19, %v1484_v59 }
 0x1ba   : > { %v555_v24 = vsel %vm553_vm8, %v550_v21, %v552_v60  ;;  %v554_v34 = vsel %vm553_vm8, %v548_v58, %v550_v21 }
 0x1bb   : > { %v561_v26 = vmul.f32 %v555_v24, %v1391_v33  ;;  %v560_v37 = vmul.f32 %v554_v34, %v1406_v46 }
 0x1bd   : > { %569 = vrot.lane.b32.xlu1 %v561_v26, %s1174_s17  ;;  %v763_v26 = vmul.f32 %v1428_v4, %v1484_v59 }
 0x1be   : > { %526 = vrot.lane.b32.xlu2 %v520_v28, %s1173_s11 }
 0x1bf   : > { %528 = vrot.lane.b32.xlu0 %v521_v29, %s1173_s11  ;;  %v591_v32 = vpop.permute.xlu1 %590 }
 0x1c0   : > { %v716_v30 = vpop.permute.xlu2 %715 }
 0x1c1   : > { %v589_v31 = vpop.permute.xlu0 %588  ;;  %v726_v17 = vmul.f32 %v716_v30, %v1484_v59 }
 0x1c2   : > { %v594_v35 = vsel %vm592_vm9, %v589_v31, %v591_v32  ;;  %v593_v44 = vsel %vm592_vm9, %v587_v2, %v589_v31 }
 0x1c3   : > { %v600_v12 = vmul.f32 %v594_v35, %v1391_v33  ;;  %v599_v50 = vmul.f32 %v593_v44, %v1406_v46  ;;  %v800_v35 = vmul.f32 %v1438_v13, %v1484_v59 }
 0x1c5   : > { %608 = vrot.lane.b32.xlu1 %v600_v12, %s1175_s19 }
 0x1c6   : > { %565 = vrot.lane.b32.xlu2 %v559_v36, %s1174_s17 }
 0x1c7   : > { %567 = vrot.lane.b32.xlu0 %v560_v37, %s1174_s17  ;;  %v646_v41 = vpop.permute.xlu1 %645 }
 0x1c8   : > { %v755_v38 = vpop.permute.xlu2 %754 }
 0x1c9   : > { %v644_v39 = vpop.permute.xlu0 %643  ;;  %v758_v40 = vsel %vm437_vm5, %v1428_v4, %v755_v38 }
 0x1ca   : > { %v648_v47 = vsel %vm320_vm2, %v644_v39, %v646_v41  ;;  %v647_v57 = vsel %vm320_vm2, %v642_v10, %v644_v39  ;;  %v764_v28 = vmul.f32 %v758_v40, %v1489_v62  ;;  %v837_v40 = vmul.f32 %v1448_v22, %v1484_v59 }
 0x1cb   : > { %v654_v48 = vmul.f32 %v648_v47, %v1470_v45  ;;  %v653_v63 = vmul.f32 %v647_v57, %v1489_v62  ;;  %vm610_vm2 = vcmask 736256  }
 0x1cd   : > { %662 = vrot.lane.b32.xlu1 %v654_v48, %s1169_s7 }
 0x1ce   : > { %604 = vrot.lane.b32.xlu2 %v598_v49, %s1175_s19 }
 0x1cf   : > { %606 = vrot.lane.b32.xlu0 %v599_v50, %s1175_s19  ;;  %v683_v56 = vpop.permute.xlu1 %682 }
 0x1d0   : > { %v792_v51 = vpop.permute.xlu2 %791 }
 0x1d1   : > { %v681_v52 = vpop.permute.xlu0 %680  ;;  %v795_v53 = vsel %vm475_vm6, %v1438_v13, %v792_v51 }
 0x1d2   : > { %v685_v58 = vsel %vm359_vm3, %v681_v52, %v683_v56  ;;  %v684_v5 = vsel %vm359_vm3, %v679_v19, %v681_v52  ;;  %v801_v4 = vmul.f32 %v795_v53, %v1489_v62 }
 0x1d3   : > { %v691_v60 = vmul.f32 %v685_v58, %v1470_v45  ;;  %v690_v9 = vmul.f32 %v684_v5, %v1489_v62 }
 0x1d5   : > { %699 = vrot.lane.b32.xlu1 %v691_v60, %s1170_s8 }
 0x1d6   : > { %658 = vrot.lane.b32.xlu2 %v652_v61, %s1169_s7 }
 0x1d7   : > { %660 = vrot.lane.b32.xlu0 %v653_v63, %s1169_s7  ;;  %v720_v3 = vpop.permute.xlu1 %719 }
 0x1d8   : > { %v829_v0 = vpop.permute.xlu2 %828 }
 0x1d9   : > { %v718_v1 = vpop.permute.xlu0 %717  ;;  %v832_v2 = vsel %vm514_vm7, %v1448_v22, %v829_v0 }
 0x1da   : > { %v722_v6 = vsel %vm398_vm4, %v718_v1, %v720_v3  ;;  %v721_v14 = vsel %vm398_vm4, %v716_v30, %v718_v1  ;;  %v838_v13 = vmul.f32 %v832_v2, %v1489_v62 }
 0x1db   : > { %v728_v7 = vmul.f32 %v722_v6, %v1470_v45  ;;  %v727_v18 = vmul.f32 %v721_v14, %v1489_v62 }
 0x1dd   : > { %736 = vrot.lane.b32.xlu1 %v728_v7, %s1171_s9  ;;  %v301_v7 = vperm.slane %v1287_v20, 0 }
 0x1de   : > { %695 = vrot.lane.b32.xlu2 %v689_v8, %s1170_s8 }
 0x1df   : > { %697 = vrot.lane.b32.xlu0 %v690_v9, %s1170_s8  ;;  %v864_v29 = vpop.permute.xlu1 %863 }
 0x1e0   : > { %v866_v10 = vpop.permute.xlu2 %865 }
 0x1e1   : > { %v757_v11 = vpop.permute.xlu0 %756  ;;  %v869_v48 = vsel %vm553_vm8, %v864_v29, %v866_v10 }
 0x1e2   : > { %v759_v15 = vsel %vm437_vm5, %v755_v38, %v757_v11  ;;  %v875_v22 = vmul.f32 %v869_v48, %v1489_v62 }
 0x1e3   : > { %v765_v16 = vmul.f32 %v759_v15, %v1470_v45 }
 0x1e5   : > { %773 = vrot.lane.b32.xlu1 %v765_v16, %s1160_s4 }
 0x1e6   : > { %732 = vrot.lane.b32.xlu2 %v726_v17, %s1171_s9  ;;  %v300_v17 = vperm.slane %v1297_v27, 0 }
 0x1e7   : > { %734 = vrot.lane.b32.xlu0 %v727_v18, %s1171_s9  ;;  %v901_v12 = vpop.permute.xlu1 %900  ;;  %v299_v18 = vperm.slane %v1295_v25, 0  ;;  %s1115_s9 = scalar_lea.hbm %s1645_s3, 48 }
 0x1e8   : > { %v903_v19 = vpop.permute.xlu2 %902  ;;  %v911_v58 = vmul.f32 %v901_v12, %v1484_v59  ;;  %p1117_p1 = scmp.lt.s32.totalorder %s1115_s9, %s1111_s6 }
 0x1e9   : > { %v794_v21 = vpop.permute.xlu0 %793  ;;  %v906_v57 = vsel %vm592_vm9, %v901_v12, %v903_v19 }
 0x1ea   : > { %v796_v23 = vsel %vm475_vm6, %v792_v51, %v794_v21  ;;  %v874_v51 = vmul.f32 %v864_v29, %v1484_v59  ;;  %v912_v60 = vmul.f32 %v906_v57, %v1489_v62  ;;  %v302_v29 = vmul.f32 %v299_v18, %v1401_v43  ;;  %p1118_p2 = por %p1117_p1, %p1116_p0 }
 0x1eb   : > { %v802_v24 = vmul.f32 %v796_v23, %v1470_v45 }
 0x1ec   : > { %p1119_p3 = pnand %p1118_p2, %p1114_p13 }
 0x1ed   : > { %810 = vrot.lane.b32.xlu1 %v802_v24, %s1172_s10 }
 0x1ee   : > { %769 = vrot.lane.b32.xlu2 %v763_v26, %s1160_s4 }
 0x1ef   : > { %771 = vrot.lane.b32.xlu0 %v764_v28, %s1160_s4  ;;  %v303_v28 = vmul.f32 %v300_v17, %v1406_v46  ;;  %s1029_s4 = smul.u32 24, %s161_s30 }
 0x1f0   : > { %v1521_v30 = vpop.permute.xlu2 %332 }
 0x1f1   : > { %v831_v31 = vpop.permute.xlu0 %830  ;;  %s1572_s20 = scalar_lea.vmem [#allocation2], %s1029_s4 }
 0x1f2   : > { %v833_v32 = vsel %vm514_vm7, %v829_v0, %v831_v31  ;;  %s949_s28 = sshll.u32 %s1572_s20, 4  ;;  %s950_s28 = int_to_ptr.vmem [resolvable:$true] %s949_s28 }
 0x1f3   : > { %v839_v34 = vmul.f32 %v833_v32, %v1470_v45 }
 0x1f5   : > { %847 = vrot.lane.b32.xlu1 %v839_v34, %s1173_s11 }
 0x1f6   : > { %806 = vrot.lane.b32.xlu2 %v800_v35, %s1172_s10 }
 0x1f7   : > { %808 = vrot.lane.b32.xlu0 %v801_v4, %s1172_s10 }
 0x1f8   : > { %v372_v36 = vpop.permute.xlu2 %371 }
 0x1f9   : > { %v868_v37 = vpop.permute.xlu0 %867 }
 0x1fa   : > { %v870_v38 = vsel %vm553_vm8, %v866_v10, %v868_v37  ;;  %v304_v10 = vmul.f32 %v301_v7, %v1391_v33  ;;  %v626_v7 = vperm.slane %v1323_v42, 1 }
 0x1fb   : > { %v876_v39 = vmul.f32 %v870_v38, %v1470_v45 }
 0x1fd   : > { %884 = vrot.lane.b32.xlu1 %v876_v39, %s1174_s17 }
 0x1fe   : > { %843 = vrot.lane.b32.xlu2 %v837_v40, %s1173_s11 }
 0x1ff   : > { %v337_v41 = vpop.permute.xlu1 %336  ;;  %845 = vrot.lane.b32.xlu0 %v838_v13, %s1173_s11 }
 0x200   : > { %v411_v44 = vpop.permute.xlu2 %410  ;;  %v346_v14 = vadd.f32 %v337_v41, %v304_v10  ;;  %v629_v10 = vmul.f32 %v626_v7, %v1484_v59 }
 0x201   : > { %v905_v47 = vpop.permute.xlu0 %904 }
 0x202   : > { %v907_v49 = vsel %vm592_vm9, %v903_v19, %v905_v47 }
 0x203   : > { %v913_v50 = vmul.f32 %v907_v49, %v1470_v45 }
 0x205   : > { %921 = vrot.lane.b32.xlu1 %v913_v50, %s1175_s19 }
 0x206   : > { %880 = vrot.lane.b32.xlu2 %v874_v51, %s1174_s17 }
 0x207   : > { %v376_v52 = vpop.permute.xlu1 %375  ;;  %882 = vrot.lane.b32.xlu0 %v875_v22, %s1174_s17 }
 0x208   : > { %v450_v56 = vpop.permute.xlu2 %449  ;;  %v385_v15 = vadd.f32 %v376_v52, %v346_v14 }
 0x209   : > { %v335_v53 = vpop.permute.xlu0 %334 }
 0x20a   : > { %v339_v24 = vsel %vm338_vm10, %v1521_v30, %v335_v53  ;;  %v340_v33 = vsel %vm338_vm10, %v335_v53, %v337_v41 }
 0x20b   : > { %v344_v32 = vadd.f32 %v339_v24, %v302_v29  ;;  %v345_v34 = vadd.f32 %v340_v33, %v303_v28 }
 0x20e   : > { %917 = vrot.lane.b32.xlu2 %v911_v58, %s1175_s19 }
 0x20f   : > { %v415_v61 = vpop.permute.xlu1 %414  ;;  %919 = vrot.lane.b32.xlu0 %v912_v60, %s1175_s19 }
 0x210   : > { %v488_v0 = vpop.permute.xlu2 %487  ;;  %v424_v16 = vadd.f32 %v415_v61, %v385_v15 }
 0x211   : > { %v374_v63 = vpop.permute.xlu0 %373 }
 0x212   : > { %v378_v25 = vsel %vm377_vm11, %v372_v36, %v374_v63  ;;  %v379_v27 = vsel %vm377_vm11, %v374_v63, %v376_v52 }
 0x213   : > { %v383_v12 = vadd.f32 %v378_v25, %v344_v32  ;;  %v384_v37 = vadd.f32 %v379_v27, %v345_v34  ;;  %v628_v34 = vperm.slane %v1343_v54, 1 }
 0x217   : > { %v454_v1 = vpop.permute.xlu1 %453 }
 0x218   : > { %v527_v3 = vpop.permute.xlu2 %526  ;;  %v462_v21 = vadd.f32 %v454_v1, %v424_v16 }
 0x219   : > { %v413_v2 = vpop.permute.xlu0 %412 }
 0x21a   : > { %v417_v35 = vsel %vm416_vm12, %v411_v44, %v413_v2  ;;  %v418_v30 = vsel %vm416_vm12, %v413_v2, %v415_v61 }
 0x21b   : > { %v422_v39 = vadd.f32 %v417_v35, %v383_v12  ;;  %v423_v40 = vadd.f32 %v418_v30, %v384_v37  ;;  %v631_v12 = vmul.f32 %v628_v34, %v1470_v45 }
 0x21f   : > { %v492_v5 = vpop.permute.xlu1 %491 }
 0x220   : > { %v566_v8 = vpop.permute.xlu2 %565  ;;  %v501_v26 = vadd.f32 %v492_v5, %v462_v21 }
 0x221   : > { %v452_v6 = vpop.permute.xlu0 %451 }
 0x222   : > { %v455_v46 = vsel %vm202_vm1, %v450_v56, %v452_v6  ;;  %v456_v38 = vsel %vm202_vm1, %v452_v6, %v454_v1 }
 0x223   : > { %v460_v47 = vadd.f32 %v455_v46, %v422_v39  ;;  %v461_v48 = vadd.f32 %v456_v38, %v423_v40 }
 0x227   : > { %v531_v9 = vpop.permute.xlu1 %530 }
 0x228   : > { %v605_v23 = vpop.permute.xlu2 %604  ;;  %v540_v31 = vadd.f32 %v531_v9, %v501_v26 }
 0x229   : > { %v490_v11 = vpop.permute.xlu0 %489 }
 0x22a   : > { %v494_v41 = vsel %vm493_vm13, %v488_v0, %v490_v11  ;;  %v495_v44 = vsel %vm493_vm13, %v490_v11, %v492_v5 }
 0x22b   : > { %v499_v22 = vadd.f32 %v494_v41, %v460_v47  ;;  %v500_v52 = vadd.f32 %v495_v44, %v461_v48 }
 0x22f   : > { %v570_v19 = vpop.permute.xlu1 %569 }
 0x230   : > { %v579_v4 = vadd.f32 %v570_v19, %v540_v31  ;;  %v659_v49 = vpop.permute.xlu2 %658 }
 0x231   : > { %v529_v20 = vpop.permute.xlu0 %528 }
 0x232   : > { %v533_v50 = vsel %vm532_vm15, %v527_v3, %v529_v20  ;;  %v534_v51 = vsel %vm532_vm15, %v529_v20, %v531_v9 }
 0x233   : > { %v538_v57 = vadd.f32 %v533_v50, %v499_v22  ;;  %v539_v58 = vadd.f32 %v534_v51, %v500_v52 }
 0x237   : > { %v609_v43 = vpop.permute.xlu1 %608 }
 0x238   : > { %v618_v36 = vadd.f32 %v609_v43, %v579_v4  ;;  %v696_v6 = vpop.permute.xlu2 %695 }
 0x239   : > { %v568_v13 = vpop.permute.xlu0 %567 }
 0x23a   : > { %622 = vst.msk [vmem:[%s1572_s20 + $0x10] sm:$0xf] %vm621_vm14, %v618_v36  ;;  %v572_v53 = vsel %vm571_vm0, %v566_v8, %v568_v13  ;;  %v573_v56 = vsel %vm571_vm0, %v568_v13, %v570_v19  ;;  %v627_v8 = vperm.slane %v1345_v55, 1 }
 0x23b   : > { %v577_v61 = vadd.f32 %v572_v53, %v538_v57  ;;  %v578_v63 = vadd.f32 %v573_v56, %v539_v58 }
 0x23c   : > { %v630_v11 = vmul.f32 %v627_v8, %v1489_v62 }
 0x23f   : > { %v663_v60 = vpop.permute.xlu1 %662 }
 0x240   : > { %v733_v19 = vpop.permute.xlu2 %732  ;;  %v671_v38 = vadd.f32 %v663_v60, %v631_v12 }
 0x241   : > { %v607_v0 = vpop.permute.xlu0 %606 }
 0x242   : > { %v611_v1 = vsel %vm610_vm2, %v605_v23, %v607_v0  ;;  %v612_v2 = vsel %vm610_vm2, %v607_v0, %v609_v43 }
 0x243   : > { %v616_v3 = vadd.f32 %v611_v1, %v577_v61  ;;  %v617_v5 = vadd.f32 %v612_v2, %v578_v63 }
 0x245   : > { %619 = vst [vmem:[%s1572_s20] sm:$0xf] %v616_v3 }
 0x246   : > { %620 = vst [vmem:[%s1572_s20 + $0x8] sm:$0xf] %v617_v5 }
 0x247   : > { %v700_v9 = vpop.permute.xlu1 %699 }
 0x248   : > { %v770_v59 = vpop.permute.xlu2 %769  ;;  %v708_v41 = vadd.f32 %v700_v9, %v671_v38 }
 0x249   : > { %v661_v14 = vpop.permute.xlu0 %660 }
 0x24a   : > { %v664_v15 = vsel %vm338_vm10, %v659_v49, %v661_v14  ;;  %v665_v16 = vsel %vm338_vm10, %v661_v14, %v663_v60 }
 0x24b   : > { %v669_v17 = vadd.f32 %v664_v15, %v629_v10  ;;  %v670_v18 = vadd.f32 %v665_v16, %v630_v11 }
 0x24f   : > { %v737_v21 = vpop.permute.xlu1 %736 }
 0x250   : > { %v807_v32 = vpop.permute.xlu2 %806  ;;  %v745_v54 = vadd.f32 %v737_v21, %v708_v41 }
 0x251   : > { %v698_v23 = vpop.permute.xlu0 %697 }
 0x252   : > { %v701_v42 = vsel %vm377_vm11, %v696_v6, %v698_v23  ;;  %v702_v55 = vsel %vm377_vm11, %v698_v23, %v700_v9 }
 0x253   : > { %v706_v20 = vadd.f32 %v701_v42, %v669_v17  ;;  %v707_v24 = vadd.f32 %v702_v55, %v670_v18 }
 0x257   : > { %v774_v33 = vpop.permute.xlu1 %773 }
 0x258   : > { %v844_v44 = vpop.permute.xlu2 %843  ;;  %v782_v48 = vadd.f32 %v774_v33, %v745_v54 }
 0x259   : > { %v735_v26 = vpop.permute.xlu0 %734 }
 0x25a   : > { %v738_v62 = vsel %vm416_vm12, %v733_v19, %v735_v26  ;;  %v739_v28 = vsel %vm416_vm12, %v735_v26, %v737_v21 }
 0x25b   : > { %v743_v29 = vadd.f32 %v738_v62, %v706_v20  ;;  %v744_v25 = vadd.f32 %v739_v28, %v707_v24 }
 0x25f   : > { %v811_v27 = vpop.permute.xlu1 %810 }
 0x260   : > { %v819_v50 = vadd.f32 %v811_v27, %v782_v48  ;;  %v881_v57 = vpop.permute.xlu2 %880 }
 0x261   : > { %v772_v31 = vpop.permute.xlu0 %771 }
 0x262   : > { %v775_v35 = vsel %vm202_vm1, %v770_v59, %v772_v31  ;;  %v776_v30 = vsel %vm202_vm1, %v772_v31, %v774_v33  ;;  %vm933_vm1 = vcmask 244740  }
 0x263   : > { %v780_v37 = vadd.f32 %v775_v35, %v743_v29  ;;  %v781_v43 = vadd.f32 %v776_v30, %v744_v25 }
 0x267   : > { %v848_v4 = vpop.permute.xlu1 %847 }
 0x268   : > { %v856_v53 = vadd.f32 %v848_v4, %v819_v50  ;;  %v918_v3 = vpop.permute.xlu2 %917 }
 0x269   : > { %v809_v46 = vpop.permute.xlu0 %808 }
 0x26a   : > { %v812_v36 = vsel %vm493_vm13, %v807_v32, %v809_v46  ;;  %v813_v39 = vsel %vm493_vm13, %v809_v46, %v811_v27 }
 0x26b   : > { %v817_v40 = vadd.f32 %v812_v36, %v780_v37  ;;  %v818_v13 = vadd.f32 %v813_v39, %v781_v43 }
 0x26f   : > { %v885_v47 = vpop.permute.xlu1 %884 }
 0x270   : > { %v893_v56 = vadd.f32 %v885_v47, %v856_v53 }
 0x271   : > { %v846_v49 = vpop.permute.xlu0 %845 }
 0x272   : > { %v849_v45 = vsel %vm532_vm15, %v844_v44, %v846_v49  ;;  %v850_v51 = vsel %vm532_vm15, %v846_v49, %v848_v4 }
 0x273   : > { %v854_v22 = vadd.f32 %v849_v45, %v817_v40  ;;  %v855_v52 = vadd.f32 %v850_v51, %v818_v13 }
 0x277   : > { %v922_v58 = vpop.permute.xlu1 %921 }
 0x278   : > { %v930_v60 = vadd.f32 %v922_v58, %v893_v56 }
 0x279   : > { %v883_v61 = vpop.permute.xlu0 %882 }
 0x27a   : > { %934 = vst.msk [vmem:[%s1572_s20 + $0x10] sm:$0xf0] %vm933_vm1, %v930_v60  ;;  %v886_v63 = vsel %vm571_vm0, %v881_v57, %v883_v61  ;;  %v887_v0 = vsel %vm571_vm0, %v883_v61, %v885_v47 }
 0x27b   : > { %v891_v1 = vadd.f32 %v886_v63, %v854_v22  ;;  %v892_v2 = vadd.f32 %v887_v0, %v855_v52 }
 0x281   : > { %v920_v5 = vpop.permute.xlu0 %919 }
 0x282   : > { %v923_v6 = vsel %vm610_vm2, %v918_v3, %v920_v5  ;;  %v924_v7 = vsel %vm610_vm2, %v920_v5, %v922_v58 }
 0x283   : > { %v928_v8 = vadd.f32 %v923_v6, %v891_v1  ;;  %v929_v9 = vadd.f32 %v924_v7, %v892_v2 }
 0x285   : > { %931 = vst [vmem:[%s1572_s20] sm:$0xf0] %v928_v8 }
 0x286   : > { %932 = vst [vmem:[%s1572_s20 + $0x8] sm:$0xf0] %v929_v9 }
 0x287   : > { %1122 = shalt.err (!%p1119_p3)
}
 0x288   : > { %1032 = dma.vmem_to_hbm [thread:$0]  (%p1234_p5), %s950_s28, 384, %s952_s29, %s936_s16  }
 0x289 PF: > { %p1038_p4 = scmp.ge.s32.totalorder %s1157_s15, 2  ;;  %s963_s17 = sand.u32 1, %s1145_s12  }
 0x28a   : > { %s964_s19 = scalar_lea.sflag [#allocation3], %s963_s17 }
 0x28b   : > { %p1035_p7 = pnand %p1038_p4, %p1238_p6 }
 0x28d   : > { %p1036_p8 = pneg %p1035_p7 }
 0x28f   : > { %1140 = dma.done.wait (%p1036_p8), %s964_s19, 384  }
 0x290   : > { %1142 = vsyncadd (%p1036_p8), %s964_s19, 4294966912  ;;  %p13_p9 = scmp.ge.s32.totalorder %s1221_s18, 4   ;;  %s1648_s12 = smov %s1149_s13 }
 0x291   : > { %s1649_s13 = smov %s1153_s14  ;;  %s1650_s14 = smov %s1232_s21 }
 0x292   : > { %s1651_s15 = smov %s1221_s18  ;;  %15 = sbr.rel (!%p13_p9) target bundleno = 3 (0x3), region = 67 }
 0x297   :  { %970 = vsyncpa [#allocation3], 1 }
 0x298   :  { %972 = vsyncpa [#allocation3 + $0x1], 1 }

</bundles_post_ra>
